<compile_context>
chip_gen: v7x
topology: tpu7x:2x2x1
jax: 0.10.0
libtpu: 0.0.40
codegen_flags: <defaults>
</compile_context>

<pallas_src>
import functools

import jax
import jax.numpy as jnp
from jax import lax
from jax.experimental import pallas as pl
from jax.experimental.pallas import tpu as pltpu

EPS_BN = 1e-5
EPS_GN = 1e-5

_MATMUL_VMEM_BUDGET = 32 * 1024 * 1024  # explicit, safe on v5e/v6e/v7x


def _round_up(x, m):
    return (x + m - 1) // m * m


# ----------------------------------------------------------------------------
# Pallas kernels
# ----------------------------------------------------------------------------
def _matmul_affine_kernel(a_ref, b_ref, scale_ref, shift_ref, *refs, act, has_res):
    if has_res:
        res_ref, o_ref, acc_ref = refs
    else:
        res_ref = None
        o_ref, acc_ref = refs

    @pl.when(pl.program_id(2) == 0)
    def _():
        acc_ref[...] = jnp.zeros_like(acc_ref)

    acc_ref[...] += jnp.dot(a_ref[...], b_ref[...], preferred_element_type=jnp.float32)

    @pl.when(pl.program_id(2) == pl.num_programs(2) - 1)
    def _():
        y = acc_ref[...] * scale_ref[...] + shift_ref[...]
        if has_res:
            y = y + res_ref[...]
        if act == "relu":
            y = jnp.maximum(y, 0.0)
        elif act == "sigmoid":
            y = 1.0 / (1.0 + jnp.exp(-y))
        o_ref[...] = y.astype(o_ref.dtype)


def _pick_k_tile(K):
    """Return (tk, Kp): K tile (multiple of 128, <=1024) minimizing (#steps, padding)."""
    Kp128 = _round_up(K, 128)
    n = Kp128 // 128
    if n <= 8:
        return Kp128, Kp128
    best_key, best_t = None, 4
    for t in range(8, 0, -1):
        nk = -(-n // t)
        key = (nk, nk * t - n, -t)
        if best_key is None or key < best_key:
            best_key, best_t = key, t
    tk = best_t * 128
    Kp = (-(-n // best_t)) * tk
    return tk, Kp


def pallas_matmul_affine(a, b, scale, shift, act="none", residual=None):
    """o = act((a @ b) * scale + shift [+ residual]).

    a:(M,K) bf16-castable, b:(K,N) bf16, scale/shift:(N,) f32, residual:(M,N) f32.
    """
    M, K = a.shape
    K2, N = b.shape
    assert K == K2

    tm = min(256, _round_up(M, 8))
    Mp = _round_up(M, tm)
    tk, Kp = _pick_k_tile(K)
    Np = _round_up(N, 128)
    tn = 256 if (Np % 256 == 0 and Np >= 256) else 128

    a_p = a.astype(jnp.bfloat16)
    if (Mp, Kp) != (M, K):
        a_p = jnp.pad(a_p, ((0, Mp - M), (0, Kp - K)))
    b_p = b.astype(jnp.bfloat16)
    if (Kp, Np) != (K, N):
        b_p = jnp.pad(b_p, ((0, Kp - K), (0, Np - N)))
    scale_p = scale.astype(jnp.float32)
    shift_p = shift.astype(jnp.float32)
    if Np != N:
        scale_p = jnp.pad(scale_p, (0, Np - N))
        shift_p = jnp.pad(shift_p, (0, Np - N))
    scale_p = scale_p.reshape(1, Np)
    shift_p = shift_p.reshape(1, Np)

    has_res = residual is not None
    operands = [a_p, b_p, scale_p, shift_p]
    in_specs = [
        pl.BlockSpec((tm, tk), lambda i, j, k: (i, k)),
        pl.BlockSpec((tk, tn), lambda i, j, k: (k, j)),
        pl.BlockSpec((1, tn), lambda i, j, k: (0, j)),
        pl.BlockSpec((1, tn), lambda i, j, k: (0, j)),
    ]
    if has_res:
        res_p = residual.astype(jnp.float32)
        if (Mp, Np) != (M, N):
            res_p = jnp.pad(res_p, ((0, Mp - M), (0, Np - N)))
        operands.append(res_p)
        in_specs.append(pl.BlockSpec((tm, tn), lambda i, j, k: (i, j)))

    grid = (Mp // tm, Np // tn, Kp // tk)
    out = pl.pallas_call(
        functools.partial(_matmul_affine_kernel, act=act, has_res=has_res),
        out_shape=jax.ShapeDtypeStruct((Mp, Np), jnp.float32),
        grid_spec=pltpu.PrefetchScalarGridSpec(
            num_scalar_prefetch=0,
            grid=grid,
            in_specs=in_specs,
            out_specs=pl.BlockSpec((tm, tn), lambda i, j, k: (i, j)),
            scratch_shapes=[pltpu.VMEM((tm, tn), jnp.float32)],
        ),
        compiler_params=pltpu.CompilerParams(
            dimension_semantics=("parallel", "parallel", "arbitrary"),
            vmem_limit_bytes=_MATMUL_VMEM_BUDGET),
    )(*operands)
    if (Mp, Np) != (M, N):
        out = out[:M, :N]
    return out


def _pick_rows_tile(R, C, itemsize=4, budget=1 << 20):
    """Row-block for (R, C) elementwise kernels: multiple of 8 dividing R (or R itself)."""
    if R <= 8:
        return R
    max_tr = min(R, max(8, budget // max(1, C * itemsize)))
    max_tr = max(8, (max_tr // 8) * 8)
    t = max_tr
    while t >= 8:
        if R % t == 0:
            return t
        t -= 8
    return R


def _add_relu_kernel(a_ref, b_ref, o_ref):
    o_ref[...] = jnp.maximum(a_ref[...] + b_ref[...], 0.0).astype(o_ref.dtype)


def pallas_add_relu(a, b):
    """relu(a + b), a/b same shape, gridded over rows with full-channel blocks."""
    shp = a.shape
    C = shp[-1]
    R = a.size // C
    a2 = a.reshape(R, C)
    b2 = b.reshape(R, C).astype(a.dtype)
    tr = _pick_rows_tile(R, C)
    out = pl.pallas_call(
        _add_relu_kernel,
        out_shape=jax.ShapeDtypeStruct((R, C), a.dtype),
        grid_spec=pltpu.PrefetchScalarGridSpec(
            num_scalar_prefetch=0,
            grid=(R // tr,),
            in_specs=[pl.BlockSpec((tr, C), lambda r: (r, 0)),
                      pl.BlockSpec((tr, C), lambda r: (r, 0))],
            out_specs=pl.BlockSpec((tr, C), lambda r: (r, 0)),
        ),
        compiler_params=pltpu.CompilerParams(dimension_semantics=("parallel",)),
    )(a2, b2)
    return out.reshape(shp)


def _gate_mul_kernel(x_ref, g_ref, o_ref, *, sig):
    g = g_ref[...]
    if sig:
        g = 1.0 / (1.0 + jnp.exp(-g))
    o_ref[...] = (x_ref[...] * g).astype(o_ref.dtype)


def pallas_gate_mul(x, g, *, sig):
    """y = x * (sigmoid(g) if sig else g), broadcasting g inside the kernel.

    x: (B, R, C); g: (B, Rg, Cg) with Rg in {1, R} and Cg in {1, C}.
    """
    B, R, C = x.shape
    _, Rg, Cg = g.shape
    tr = _pick_rows_tile(R, C)
    gr = tr if Rg == R else 1
    if Rg == R:
        g_map = lambda b, r: (b, r, 0)
    else:
        g_map = lambda b, r: (b, 0, 0)
    out = pl.pallas_call(
        functools.partial(_gate_mul_kernel, sig=sig),
        out_shape=jax.ShapeDtypeStruct((B, R, C), x.dtype),
        grid_spec=pltpu.PrefetchScalarGridSpec(
            num_scalar_prefetch=0,
            grid=(B, R // tr),
            in_specs=[pl.BlockSpec((1, tr, C), lambda b, r: (b, r, 0)),
                      pl.BlockSpec((1, gr, Cg), g_map)],
            out_specs=pl.BlockSpec((1, tr, C), lambda b, r: (b, r, 0)),
        ),
        compiler_params=pltpu.CompilerParams(
            dimension_semantics=("parallel", "parallel")),
    )(x, g.astype(x.dtype))
    return out


# ----------------------------------------------------------------------------
# Conv (im2col + Pallas matmul) and glue ops
# ----------------------------------------------------------------------------
def im2col(x, k, stride, padding):
    x = x.astype(jnp.bfloat16)  # matmul operand dtype; halves im2col HBM traffic
    B, H, W, C = x.shape
    if padding:
        x = jnp.pad(x, ((0, 0), (padding, padding), (padding, padding), (0, 0)))
    Hp, Wp = x.shape[1], x.shape[2]
    Ho = (Hp - k) // stride + 1
    Wo = (Wp - k) // stride + 1
    cols = []
    for dy in range(k):
        for dx in range(k):
            cols.append(x[:, dy:dy + (Ho - 1) * stride + 1:stride,
                          dx:dx + (Wo - 1) * stride + 1:stride, :])
    patches = cols[0] if len(cols) == 1 else jnp.concatenate(cols, axis=-1)
    return patches.reshape(B * Ho * Wo, k * k * C), (B, Ho, Wo)


def apply_conv(p, x, residual=None, act=None):
    cols, (B, Ho, Wo) = im2col(x, p["k"], p["stride"], p["padding"])
    res2 = None
    if residual is not None:
        res2 = residual.reshape(B * Ho * Wo, residual.shape[-1])
    out = pallas_matmul_affine(cols, p["w"], p["scale"], p["shift"],
                               act=p["act"] if act is None else act,
                               residual=res2)
    return out.reshape(B, Ho, Wo, -1)


def avg_pool2(x):  # AvgPool2d(kernel=2, stride=2)
    B, H, W, C = x.shape
    return x.reshape(B, H // 2, 2, W // 2, 2, C).mean(axis=(2, 4))


def max_pool_3_2_1(x):  # MaxPool2d(kernel=3, stride=2, padding=1)
    return lax.reduce_window(
        x, jnp.array(-jnp.inf, x.dtype), lax.max,
        window_dimensions=(1, 3, 3, 1), window_strides=(1, 2, 2, 1),
        padding=((0, 0), (1, 1), (1, 1), (0, 0)))


def upsample2(x):  # nn.Upsample(scale_factor=2), mode='nearest'
    return jnp.repeat(jnp.repeat(x, 2, axis=1), 2, axis=2)


# ----------------------------------------------------------------------------
# Parameter construction (deterministic, synthetic)
# ----------------------------------------------------------------------------
class KeyGen:
    def __init__(self, seed=0):
        self._key = jax.random.PRNGKey(seed)
        self._i = 0

    def __call__(self):
        self._i += 1
        return jax.random.fold_in(self._key, self._i)


def make_conv(kg, cin, cout, k, stride=1, padding=None, bias=False, bn=True, act="relu"):
    if padding is None:
        padding = k // 2
    w = jax.random.normal(kg(), (k, k, cin, cout), jnp.float32) * (2.0 / (cin * k * k)) ** 0.5
    b = (jax.random.normal(kg(), (cout,), jnp.float32) * 0.01
         if bias else jnp.zeros((cout,), jnp.float32))
    if bn:
        gamma = jnp.ones((cout,), jnp.float32)
        beta = jnp.zeros((cout,), jnp.float32)
        mean = jnp.zeros((cout,), jnp.float32)
        var = jnp.ones((cout,), jnp.float32)
        scale = gamma / jnp.sqrt(var + EPS_BN)
        shift = (b - mean) * scale + beta
    else:
        scale = jnp.ones((cout,), jnp.float32)
        shift = b
    # weights stored as bf16 im2col matrices (MXU-native)
    return dict(w=w.reshape(k * k * cin, cout).astype(jnp.bfloat16),
                k=k, stride=stride, padding=padding,
                scale=scale, shift=shift, act=act)


def make_sa(kg, channel, groups):
    half = channel // (2 * groups)
    return dict(groups=groups, half=half,
                cweight=jnp.zeros((half,), jnp.float32), cbias=jnp.ones((half,), jnp.float32),
                sweight=jnp.zeros((half,), jnp.float32), sbias=jnp.ones((half,), jnp.float32),
                gn_w=jnp.ones((half,), jnp.float32), gn_b=jnp.zeros((half,), jnp.float32))


def apply_sa(p, x):
    B, H, W, C = x.shape
    g = p["groups"]
    cg = C // g
    half = p["half"]
    # (b, c, h, w) -> (b*groups, c//groups, h, w) equivalent in NHWC, flattened spatially
    xg = x.reshape(B, H, W, g, cg).transpose(0, 3, 1, 2, 4).reshape(B * g, H * W, cg)
    x0 = xg[..., :half]          # (Bg, HW, half)
    x1 = xg[..., half:]
    # channel attention branch: tiny per-(group,channel) gate, broadcast in-kernel
    xn = jnp.mean(x0, axis=1, keepdims=True)             # (Bg, 1, half)
    xn = p["cweight"] * xn + p["cbias"]
    x0o = pallas_gate_mul(x0, xn, sig=True)
    # spatial branch: GroupNorm(num_groups == num_channels) -> per-channel norm over H,W
    mu = jnp.mean(x1, axis=1, keepdims=True)
    var = jnp.mean((x1 - mu) ** 2, axis=1, keepdims=True)
    xs = (x1 - mu) / jnp.sqrt(var + EPS_GN)
    xs = xs * p["gn_w"] + p["gn_b"]
    xs = p["sweight"] * xs + p["sbias"]
    x1o = pallas_gate_mul(x1, xs, sig=True)
    out = jnp.concatenate([x0o, x1o], axis=-1)           # (Bg, HW, cg)
    out = out.reshape(B, g, H, W, cg).transpose(0, 2, 3, 1, 4).reshape(B, H, W, C)
    # channel_shuffle with 2 groups
    out = out.reshape(B, H, W, 2, C // 2).transpose(0, 1, 2, 4, 3).reshape(B, H, W, C)
    return out


def make_att(kg, F_g, F_l, F_int):
    # NOTE: Attention_block.sa_layer is created in the PyTorch module but never
    # used in forward(); it is intentionally omitted here.
    return dict(W_g=make_conv(kg, F_g, F_int, 1, bias=True, bn=True, act="none"),
                W_x=make_conv(kg, F_l, F_int, 1, bias=True, bn=True, act="none"),
                psi=make_conv(kg, F_int, 1, 1, bias=True, bn=True, act="sigmoid"))


def apply_att(p, g, x):
    g1 = apply_conv(p["W_g"], g)
    # relu(W_g(g) + W_x(x)) fused into the W_x matmul epilogue (residual + relu)
    psi = apply_conv(p["W_x"], x, residual=g1, act="relu")
    psi = apply_conv(p["psi"], psi)          # conv1x1 + BN + sigmoid (fused)
    B, H, W, C = x.shape
    out = pallas_gate_mul(x.reshape(B, H * W, C), psi.reshape(B, H * W, 1), sig=False)
    return out.reshape(B, H, W, C)


def make_bottleneck(kg, inplanes, planes, stride=1, downsample=False):
    width = planes  # groups=1, base_width=64
    return dict(
        conv1=make_conv(kg, inplanes, width, 1, act="relu"),
        conv2=make_conv(kg, width, width, 3, stride=stride, act="relu"),
        conv3=make_conv(kg, width, planes * 4, 1, act="none"),
        sa=make_sa(kg, planes * 4, 64),
        downsample=(make_conv(kg, inplanes, planes * 4, 1, stride=stride, act="none")
                    if downsample else None),
    )


def apply_bottleneck(p, x):
    out = apply_conv(p["conv1"], x)
    out = apply_conv(p["conv2"], out)
    out = apply_conv(p["conv3"], out)
    out = apply_sa(p["sa"], out)
    if p["downsample"] is not None:
        # relu(downsample(x) + sa_out) fused into the downsample matmul epilogue
        return apply_conv(p["downsample"], x, residual=out, act="relu")
    return pallas_add_relu(out, x)


def make_layer(kg, inplanes, planes, blocks, stride=1):
    layers = [make_bottleneck(kg, inplanes, planes, stride,
                              downsample=(stride != 1 or inplanes != planes * 4))]
    for _ in range(1, blocks):
        layers.append(make_bottleneck(kg, planes * 4, planes))
    return layers


def apply_layer(blocks, x):
    for b in blocks:
        x = apply_bottleneck(b, x)
    return x


def make_conv_block(kg, cin, cout):  # conv_block / Bridge (ConvBlock x2)
    return [make_conv(kg, cin, cout, 3, bias=True, bn=True, act="relu"),
            make_conv(kg, cout, cout, 3, bias=True, bn=True, act="relu")]


def apply_seq(ps, x):
    for p in ps:
        x = apply_conv(p, x)
    return x


def make_up_conv(kg, cin, cout):
    return make_conv(kg, cin, cout, 3, bias=True, bn=True, act="relu")


def apply_up_conv(p, x):
    return apply_conv(p, upsample2(x))


def build_params(seed=0, n_classes=2):
    kg = KeyGen(seed)
    P = {}
    # SA-ResNet50 encoder
    P["conv1"] = make_conv(kg, 3, 64, 7, stride=2, padding=3, act="relu")
    P["layer1"] = make_layer(kg, 64, 64, 3, stride=1)
    P["layer2"] = make_layer(kg, 256, 128, 4, stride=2)
    P["layer3"] = make_layer(kg, 512, 256, 6, stride=2)
    P["layer4"] = make_layer(kg, 1024, 512, 3, stride=2)
    # decoder
    P["bridge"] = make_conv_block(kg, 2048, 2048)
    P["expand1"] = make_conv(kg, 3, 64, 1)
    P["expand2"] = make_conv(kg, 3, 64, 1)
    P["expand3"] = make_conv(kg, 3, 512, 1)
    P["expand4"] = make_conv(kg, 3, 1024, 1)
    P["shink1"] = make_conv(kg, 128, 64, 1)
    P["shink2"] = make_conv(kg, 128, 64, 1)
    P["shink3"] = make_conv(kg, 1024, 512, 1)
    P["shink4"] = make_conv(kg, 2048, 1024, 1)
    P["Up5"] = make_up_conv(kg, 2048, 1024)
    P["Att5"] = make_att(kg, 1024, 1024, 512)
    P["conv3x3_5"] = make_conv(kg, 1024, 1024, 3, bias=False, bn=False, act="none")
    P["sa5"] = make_sa(kg, 1024, 64)
    P["Up_conv5"] = make_conv_block(kg, 2048, 1024)
    P["Up4"] = make_up_conv(kg, 1024, 512)
    P["Att4"] = make_att(kg, 512, 512, 256)
    P["conv3x3_4"] = make_conv(kg, 512, 512, 3, bias=False, bn=False, act="none")
    P["sa4"] = make_sa(kg, 512, 64)
    P["Up_conv4"] = make_conv_block(kg, 1024, 512)
    P["Up3"] = make_up_conv(kg, 512, 256)
    P["Att3"] = make_att(kg, 256, 256, 64)
    P["conv3x3_3"] = make_conv(kg, 256, 256, 3, bias=False, bn=False, act="none")
    P["sa3"] = make_sa(kg, 256, 64)
    P["Up_conv3"] = make_conv_block(kg, 512, 256)
    P["Up2"] = make_up_conv(kg, 256, 128)
    P["Att2"] = make_att(kg, 128, 64, 32)
    P["conv3x3_2"] = make_conv(kg, 64, 64, 3, bias=False, bn=False, act="none")
    P["sa2"] = make_sa(kg, 64, 32)
    P["Up_conv2"] = make_conv_block(kg, 128 + 64, 128)
    P["Up1"] = make_up_conv(kg, 128, 64)
    P["Up_conv1"] = make_conv_block(kg, 64 + 3, 64)
    P["out"] = make_conv(kg, 64, n_classes, 1, bias=True, bn=False, act="none")
    return P


# ----------------------------------------------------------------------------
# Forward pass (mirrors UNetplusWithSAResnet50EncoderandAGsSA.forward)
# ----------------------------------------------------------------------------
def forward(P, x_nchw):
    x = jnp.transpose(x_nchw, (0, 2, 3, 1))  # NCHW -> NHWC
    img0 = x
    img1 = avg_pool2(img0)
    img2 = avg_pool2(img1)
    img3 = avg_pool2(img2)
    img4 = avg_pool2(img3)

    pre = {0: x}
    x = apply_conv(P["conv1"], x)                                   # input_block (conv+bn+relu)
    x = apply_conv(P["shink1"],
                   jnp.concatenate([x, apply_conv(P["expand1"], img1)], axis=-1))
    pre[1] = x
    x = max_pool_3_2_1(x)                                           # input_pool
    x = apply_conv(P["shink2"],
                   jnp.concatenate([x, apply_conv(P["expand2"], img2)], axis=-1))
    x = apply_layer(P["layer1"], x)
    pre[2] = x
    x = apply_layer(P["layer2"], x)
    pre[3] = x
    x = apply_conv(P["shink3"],
                   jnp.concatenate([x, apply_conv(P["expand3"], img3)], axis=-1))
    x = apply_layer(P["layer3"], x)
    pre[4] = x
    x = apply_conv(P["shink4"],
                   jnp.concatenate([x, apply_conv(P["expand4"], img4)], axis=-1))
    x = apply_layer(P["layer4"], x)
    x = apply_seq(P["bridge"], x)

    d5 = apply_up_conv(P["Up5"], x)
    x4 = apply_att(P["Att5"], d5, pre[4])
    x4 = apply_conv(P["conv3x3_5"], x4)
    x4 = apply_sa(P["sa5"], x4)
    d5 = apply_seq(P["Up_conv5"], jnp.concatenate([x4, d5], axis=-1))

    d4 = apply_up_conv(P["Up4"], d5)
    x3 = apply_att(P["Att4"], d4, pre[3])
    x3 = apply_conv(P["conv3x3_4"], x3)
    x3 = apply_sa(P["sa4"], x3)
    d4 = apply_seq(P["Up_conv4"], jnp.concatenate([x3, d4], axis=-1))

    d3 = apply_up_conv(P["Up3"], d4)
    x2 = apply_att(P["Att3"], d3, pre[2])
    x2 = apply_conv(P["conv3x3_3"], x2)
    x2 = apply_sa(P["sa3"], x2)
    d3 = apply_seq(P["Up_conv3"], jnp.concatenate([x2, d3], axis=-1))

    d2 = apply_up_conv(P["Up2"], d3)
    x1 = apply_att(P["Att2"], d2, pre[1])
    x1 = apply_conv(P["conv3x3_2"], x1)
    x1 = apply_sa(P["sa2"], x1)
    d2 = apply_seq(P["Up_conv2"], jnp.concatenate([x1, d2], axis=-1))

    d1 = apply_up_conv(P["Up1"], d2)
    d1 = jnp.concatenate([pre[0], d1], axis=-1)
    d1 = apply_seq(P["Up_conv1"], d1)
    out = apply_conv(P["out"], d1)
    return jnp.transpose(out, (0, 3, 1, 2))  # NHWC -> NCHW


if __name__ == "__main__":
    # Input spatial size must be divisible by 32 (5 downsampling stages); keep it small.
    key = jax.random.PRNGKey(0)
    x = jax.random.normal(key, (1, 3, 32, 32), jnp.float32)

    params = build_params(seed=0, n_classes=2)
    out = forward(params, x)
    out = jax.block_until_ready(out)
    assert out.shape == (1, 2, 32, 32), out.shape
    print("KERNEL_OK")
</pallas_src>

<mosaic_0001>
module attributes {stable_mosaic.version = 11 : i64} {
  func.func @_matmul_affine_kernel(%arg0: i32, %arg1: i32, %arg2: i32, %arg3: memref<256x256xbf16, #tpu.memory_space<vmem>>, %arg4: memref<256x128xbf16, #tpu.memory_space<vmem>>, %arg5: memref<1x128xf32, #tpu.memory_space<vmem>>, %arg6: memref<1x128xf32, #tpu.memory_space<vmem>>, %arg7: memref<256x128xf32, #tpu.memory_space<vmem>>, %arg8: memref<256x128xf32, #tpu.memory_space<vmem>>) attributes {dimension_semantics = [#tpu.dimension_semantics<parallel>, #tpu.dimension_semantics<parallel>, #tpu.dimension_semantics<arbitrary>], iteration_bounds = array<i64: 1, 1, 1>, scalar_prefetch = 0 : i64, scratch_operands = 1 : i64, tpu.core_type = #tpu.core_type<tc>, window_params = [{transform_indices = @transform_0, window_bounds = array<i64: 256, 256>}, {transform_indices = @transform_1, window_bounds = array<i64: 256, 128>}, {transform_indices = @transform_2, window_bounds = array<i64: 1, 128>}, {transform_indices = @transform_3, window_bounds = array<i64: 1, 128>}, {transform_indices = @transform_4, window_bounds = array<i64: 256, 128>}]} {
    %c0_i32 = arith.constant 0 : i32
    %0 = arith.cmpi eq, %arg2, %c0_i32 : i32
    %1 = arith.extui %0 : i1 to i32
    %c0_i32_0 = arith.constant 0 : i32
    %2 = arith.cmpi ne, %1, %c0_i32_0 : i32
    scf.if %2 {
      %cst_10 = arith.constant 0.000000e+00 : f32
      %12 = vector.broadcast %cst_10 : f32 to vector<256x128xf32>
      %c0_11 = arith.constant 0 : index
      %c0_12 = arith.constant 0 : index
      %13 = vector.load %arg8[%c0_11, %c0_12] : memref<256x128xf32, #tpu.memory_space<vmem>>, vector<256x128xf32>
      tpu.vector_store %arg8[%c0_11, %c0_12], %12 {strides = array<i32>} : memref<256x128xf32, #tpu.memory_space<vmem>>, vector<256x128xf32>,
    } else {
    }
    %c0 = arith.constant 0 : index
    %c0_1 = arith.constant 0 : index
    %3 = vector.load %arg8[%c0, %c0_1] : memref<256x128xf32, #tpu.memory_space<vmem>>, vector<256x128xf32>
    %c0_2 = arith.constant 0 : index
    %c0_3 = arith.constant 0 : index
    %4 = vector.load %arg3[%c0_2, %c0_3] : memref<256x256xbf16, #tpu.memory_space<vmem>>, vector<256x256xbf16>
    %c0_4 = arith.constant 0 : index
    %c0_5 = arith.constant 0 : index
    %5 = vector.load %arg4[%c0_4, %c0_5] : memref<256x128xbf16, #tpu.memory_space<vmem>>, vector<256x128xbf16>
    %cst = arith.constant dense<0.000000e+00> : vector<256x128xf32>
    %6 = tpu.matmul %4, %5, %cst {dimension_numbers = #tpu.dot_dimension_numbers<[1], [0], [0], [1], [0, 0, 1, 1], [], []>} : vector<256x256xbf16>, vector<256x128xbf16>, vector<256x128xf32> -> vector<256x128xf32>
    %7 = arith.addf %3, %6 : vector<256x128xf32>
    %c0_6 = arith.constant 0 : index
    %c0_7 = arith.constant 0 : index
    %8 = vector.load %arg8[%c0_6, %c0_7] : memref<256x128xf32, #tpu.memory_space<vmem>>, vector<256x128xf32>
    tpu.vector_store %arg8[%c0_6, %c0_7], %7 {strides = array<i32>} : memref<256x128xf32, #tpu.memory_space<vmem>>, vector<256x128xf32>,
    %c0_i32_8 = arith.constant 0 : i32
    %9 = arith.cmpi eq, %arg2, %c0_i32_8 : i32
    %10 = arith.extui %9 : i1 to i32
    %c0_i32_9 = arith.constant 0 : i32
    %11 = arith.cmpi ne, %10, %c0_i32_9 : i32
    scf.if %11 {
      %c0_10 = arith.constant 0 : index
      %c0_11 = arith.constant 0 : index
      %12 = vector.load %arg8[%c0_10, %c0_11] : memref<256x128xf32, #tpu.memory_space<vmem>>, vector<256x128xf32>
      %c0_12 = arith.constant 0 : index
      %c0_13 = arith.constant 0 : index
      %13 = vector.load %arg5[%c0_12, %c0_13] : memref<1x128xf32, #tpu.memory_space<vmem>>, vector<1x128xf32>
      %14 = vector.broadcast %13 : vector<1x128xf32> to vector<256x128xf32>
      %15 = arith.mulf %12, %14 : vector<256x128xf32>
      %c0_14 = arith.constant 0 : index
      %c0_15 = arith.constant 0 : index
      %16 = vector.load %arg6[%c0_14, %c0_15] : memref<1x128xf32, #tpu.memory_space<vmem>>, vector<1x128xf32>
      %17 = vector.broadcast %16 : vector<1x128xf32> to vector<256x128xf32>
      %18 = arith.addf %15, %17 : vector<256x128xf32>
      %cst_16 = arith.constant 0.000000e+00 : f32
      %19 = vector.broadcast %cst_16 : f32 to vector<256x128xf32>
      %20 = arith.maximumf %18, %19 : vector<256x128xf32>
      %c0_17 = arith.constant 0 : index
      %c0_18 = arith.constant 0 : index
      %21 = vector.load %arg7[%c0_17, %c0_18] : memref<256x128xf32, #tpu.memory_space<vmem>>, vector<256x128xf32>
      tpu.vector_store %arg7[%c0_17, %c0_18], %20 {strides = array<i32>} : memref<256x128xf32, #tpu.memory_space<vmem>>, vector<256x128xf32>,
    } else {
    }
    return
  }
  func.func @transform_0(%arg0: i32, %arg1: i32, %arg2: i32) -> (i32, i32) {
    %c0_i32 = arith.constant 0 : i32
    return %arg0, %arg2 : i32, i32
  }
  func.func @transform_1(%arg0: i32, %arg1: i32, %arg2: i32) -> (i32, i32) {
    %c0_i32 = arith.constant 0 : i32
    return %arg2, %arg1 : i32, i32
  }
  func.func @transform_2(%arg0: i32, %arg1: i32, %arg2: i32) -> (i32, i32) {
    %c0_i32 = arith.constant 0 : i32
    %c0_i32_0 = arith.constant 0 : i32
    return %c0_i32, %arg1 : i32, i32
  }
  func.func @transform_3(%arg0: i32, %arg1: i32, %arg2: i32) -> (i32, i32) {
    %c0_i32 = arith.constant 0 : i32
    %c0_i32_0 = arith.constant 0 : i32
    return %c0_i32, %arg1 : i32, i32
  }
  func.func @transform_4(%arg0: i32, %arg1: i32, %arg2: i32) -> (i32, i32) {
    %c0_i32 = arith.constant 0 : i32
    return %arg0, %arg1 : i32, i32
  }
}

</mosaic_0001>

<bundles_post_ra>
// kernel: tpu_custom_call.1
= control target key start
LH: loop header
LB: loop body
LE: loop exit
PB: predicated region body
PF: predicated region fallthrough
CT: control target
= control target key end

     0   :  { %9 = vsyncpa [#allocation4], 0  ;;  %s1324_s0 = inlined_call_operand.hbm [shape: bf16[256,256], index: 0, kind: input, shape index: {}]   ;;  %s1325_s1 = inlined_call_operand.hbm [shape: bf16[256,128], index: 1, kind: input, shape index: {}]   ;;  %s1326_s2 = inlined_call_operand.vmem [shape: f32[1,128], index: 2, kind: input, shape index: {}]   ;;  %s1327_s3 = inlined_call_operand.vmem [shape: f32[1,128], index: 3, kind: input, shape index: {}]   ;;  %s1328_s4 = inlined_call_operand.hbm [shape: f32[256,128], index: 4, kind: output, shape index: {}]  }
   0x1   :  { %10 = vsyncpa [#allocation7], 0 }
   0x2   :  { %11 = vsyncpa [#allocation5], 0  ;;  %s1176_s15 = smov [#allocation3]   ;;  %s1104_s19 = scalar_lea.hbm %s1324_s0, 4096 }
   0x3   :  { %s17_s16 = sshll.u32 %s1176_s15, 4  ;;  %p1105_p0 = scmp.ne.s32.totalorder %s1324_s0, %s1104_s19  ;;  %s18_s16 = int_to_ptr.vmem [resolvable:$true] %s17_s16 }
   0x4   :  { %p1108_p1 = scmp.lt.u32.totalorder %s1104_s19, %s1324_s0 }
   0x6   :  { %p1110_p2 = pnand %p1108_p1, %p1105_p0 }
   0x8   :  { %1113 = shalt.err (!%p1110_p2)
}
   0x9   :  { %s1114_s24 = scalar_lea.vmem %s18_s16, 4096  ;;  %p1119_p4 = scmp.lt.s32.totalorder %s18_s16, %s18_s16 }
   0xa   :  { %p1115_p3 = scmp.ne.s32.totalorder %s18_s16, %s1114_s24  ;;  %p1120_p5 = scmp.lt.s32.totalorder %s1114_s24, %s1114_s24 }
   0xc   :  { %p1121_p6 = por %p1120_p5, %p1119_p4 }
   0xe   :  { %p1122_p7 = pnand %p1121_p6, %p1115_p3 }
  0x10   :  { %1125 = shalt.err (!%p1122_p7)
}
  0x11   :  { %s1177_s25 = smov 128   ;;  %s1178_s26 = smov 8  }
  0x12   :  { %23 = dma.hbm_to_vmem [thread:$0]  %s1324_s0, 4096, %s18_s16, [#allocation4], %s1177_s25, %s1177_s25, %s1178_s26  }
  0x13   :  { %s1179_s29 = smov [#allocation6]   ;;  %s1126_s7 = scalar_lea.hbm %s1325_s1, 2048 }
  0x14   :  { %s29_s30 = sshll.u32 %s1179_s29, 4  ;;  %p1127_p8 = scmp.ne.s32.totalorder %s1325_s1, %s1126_s7  ;;  %s30_s30 = int_to_ptr.vmem [resolvable:$true] %s29_s30 }
  0x15   :  { %p1130_p9 = scmp.lt.u32.totalorder %s1126_s7, %s1325_s1 }
  0x17   :  { %p1132_p10 = pnand %p1130_p9, %p1127_p8 }
  0x19   :  { %1135 = shalt.err (!%p1132_p10)
}
  0x1a   :  { %s1136_s12 = scalar_lea.vmem %s30_s30, 2048  ;;  %p1141_p12 = scmp.lt.s32.totalorder %s30_s30, %s30_s30 }
  0x1b   :  { %p1137_p11 = scmp.ne.s32.totalorder %s30_s30, %s1136_s12  ;;  %p1142_p13 = scmp.lt.s32.totalorder %s1136_s12, %s1136_s12 }
  0x1d   :  { %p1143_p0 = por %p1142_p13, %p1141_p12 }
  0x1f   :  { %p1144_p1 = pnand %p1143_p0, %p1137_p11 }
  0x21   :  { %1147 = shalt.err (!%p1144_p1)
}
  0x22   :  { %s1180_s0 = smov 64   ;;  %s1181_s13 = smov 4  }
  0x23   :  { %35 = dma.hbm_to_vmem [thread:$0]  %s1325_s1, 2048, %s30_s30, [#allocation7], %s1180_s0, %s1180_s0, %s1181_s13  }
  0x24   :  { %1170 = dma.done.wait [#allocation4], 4096  }
  0x25   :  { %1171 = vsyncadd [#allocation4], 4294963200 }
  0x26   :  { %1172 = dma.done.wait [#allocation7], 2048  }
  0x27   :  { %1173 = vsyncadd [#allocation7], 4294965248  ;;  %v1040_v0 = vld [vmem:[#allocation6 + $0x40] sm:$0xff]   ;;  %v1042_v2 = vld [vmem:[#allocation6 + $0x48] sm:$0xff]  }
  0x28   :  { %v1041_v1 = vld [vmem:[#allocation6] sm:$0xff]   ;;  %905 = vmatprep.subr.bf16.mxu0 %v1040_v0  ;;  %1017 = vmatprep.subr.bf16.mxu1 %v1040_v0  ;;  %v1043_v3 = vld [vmem:[#allocation6 + $0x8] sm:$0xff]   ;;  %v1044_v4 = vld [vmem:[#allocation6 + $0x50] sm:$0xff]  }
  0x29   :  { %906 = vmatpush3.bf16.msra.mxu0 %v1041_v1  ;;  %1025 = vmatpush3.bf16.msra.mxu1 %v1041_v1  ;;  %v1045_v5 = vld [vmem:[#allocation6 + $0x10] sm:$0xff]   ;;  %v1046_v6 = vld [vmem:[#allocation6 + $0x58] sm:$0xff]   ;;  %v1048_v8 = vld [vmem:[#allocation6 + $0x60] sm:$0xff]  }
  0x2a   :  { %907 = vmatprep.subr.bf16.mxu0 %v1042_v2  ;;  %1018 = vmatprep.subr.bf16.mxu1 %v1042_v2  ;;  %v1047_v7 = vld [vmem:[#allocation6 + $0x18] sm:$0xff]   ;;  %v1049_v9 = vld [vmem:[#allocation6 + $0x20] sm:$0xff]   ;;  %v1050_v10 = vld [vmem:[#allocation6 + $0x68] sm:$0xff]  }
  0x2b   :  { %v1058_v11 = vld [vmem:[#allocation3 + $0x4] ss:$8 sps:$4 sm:$0xff]   ;;  %v1052_v14 = vld [vmem:[#allocation6 + $0x70] sm:$0xff]   ;;  %v1054_v16 = vld [vmem:[#allocation6 + $0x78] sm:$0xff]  }
  0x2c   :  { %v1061_v12 = vld [vmem:[#allocation3 + $0x84] ss:$8 sps:$4 sm:$0xff]   ;;  %467 = vmatprep.mubr.bf16.mxu0 %v1058_v11  ;;  %v1053_v15 = vld [vmem:[#allocation6 + $0x30] sm:$0xff]   ;;  %v1055_v17 = vld [vmem:[#allocation6 + $0x38] sm:$0xff]  }
  0x2d   :  { %908 = vmatpush3.bf16.msra.mxu0 %v1043_v3  ;;  %1026 = vmatpush3.bf16.msra.mxu1 %v1043_v3  ;;  %v1051_v13 = vld [vmem:[#allocation6 + $0x28] sm:$0xff]   ;;  %v1062_v20 = vld [vmem:[#allocation3 + $0x14] ss:$8 sps:$4 sm:$0xff]   ;;  %v1066_v22 = vld [vmem:[#allocation3 + $0x10] ss:$8 sps:$4 sm:$0xff]  }
  0x2e   :  { %909 = vmatprep.subr.bf16.mxu0 %v1044_v4  ;;  %1019 = vmatprep.subr.bf16.mxu1 %v1044_v4  ;;  %v1056_v18 = vld [vmem:[#allocation3] ss:$8 sps:$4 sm:$0xff]   ;;  %v1064_v21 = vld [vmem:[#allocation3 + $0x94] ss:$8 sps:$4 sm:$0xff]   ;;  %v1067_v23 = vld [vmem:[#allocation3 + $0x90] ss:$8 sps:$4 sm:$0xff]  }
  0x2f   :  { %531 = vmatprep.mubr.bf16.mxu1 %v1061_v12  ;;  %v1059_v19 = vld [vmem:[#allocation3 + $0x80] ss:$8 sps:$4 sm:$0xff]   ;;  %v1068_v24 = vld [vmem:[#allocation3 + $0x24] ss:$8 sps:$4 sm:$0xff]   ;;  %v1074_v28 = vld [vmem:[#allocation3 + $0x34] ss:$8 sps:$4 sm:$0xff]  }
  0x30   :  { %v1070_v25 = vld [vmem:[#allocation3 + $0xa4] ss:$8 sps:$4 sm:$0xff]   ;;  %v1072_v26 = vld [vmem:[#allocation3 + $0x20] ss:$8 sps:$4 sm:$0xff]   ;;  %v1076_v29 = vld [vmem:[#allocation3 + $0xb4] ss:$8 sps:$4 sm:$0xff]  }
  0x31   :  { %910 = vmatpush3.bf16.msra.mxu0 %v1045_v5  ;;  %1027 = vmatpush3.bf16.msra.mxu1 %v1045_v5  ;;  %v1073_v27 = vld [vmem:[#allocation3 + $0xa0] ss:$8 sps:$4 sm:$0xff]   ;;  %v1078_v30 = vld [vmem:[#allocation3 + $0x30] ss:$8 sps:$4 sm:$0xff]   ;;  %v1080_v32 = vld [vmem:[#allocation3 + $0x44] ss:$8 sps:$4 sm:$0xff]  }
  0x32   :  { %911 = vmatprep.subr.bf16.mxu0 %v1046_v6  ;;  %1020 = vmatprep.subr.bf16.mxu1 %v1046_v6  ;;  %v1079_v31 = vld [vmem:[#allocation3 + $0xb0] ss:$8 sps:$4 sm:$0xff]   ;;  %v1082_v33 = vld [vmem:[#allocation3 + $0xc4] ss:$8 sps:$4 sm:$0xff]   ;;  %v1084_v34 = vld [vmem:[#allocation3 + $0x40] ss:$8 sps:$4 sm:$0xff]  }
  0x33   :  { %v1085_v35 = vld [vmem:[#allocation3 + $0xc0] ss:$8 sps:$4 sm:$0xff]   ;;  %v1086_v36 = vld [vmem:[#allocation3 + $0x54] ss:$8 sps:$4 sm:$0xff]   ;;  %v1090_v38 = vld [vmem:[#allocation3 + $0x50] ss:$8 sps:$4 sm:$0xff]  }
  0x34   :  { %v1088_v37 = vld [vmem:[#allocation3 + $0xd4] ss:$8 sps:$4 sm:$0xff]   ;;  %v1091_v39 = vld [vmem:[#allocation3 + $0xd0] ss:$8 sps:$4 sm:$0xff]   ;;  %v1092_v40 = vld [vmem:[#allocation3 + $0x64] ss:$8 sps:$4 sm:$0xff]  }
  0x35   :  { %912 = vmatpush3.bf16.msra.mxu0 %v1047_v7  ;;  %1028 = vmatpush3.bf16.msra.mxu1 %v1047_v7  ;;  %v1094_v41 = vld [vmem:[#allocation3 + $0xe4] ss:$8 sps:$4 sm:$0xff]   ;;  %v1096_v42 = vld [vmem:[#allocation3 + $0x60] ss:$8 sps:$4 sm:$0xff]   ;;  %v1098_v44 = vld [vmem:[#allocation3 + $0x74] ss:$8 sps:$4 sm:$0xff]  }
  0x36   :  { %913 = vmatprep.subr.bf16.mxu0 %v1048_v8  ;;  %1021 = vmatprep.subr.bf16.mxu1 %v1048_v8  ;;  %v1097_v43 = vld [vmem:[#allocation3 + $0xe0] ss:$8 sps:$4 sm:$0xff]   ;;  %v1100_v45 = vld [vmem:[#allocation3 + $0xf4] ss:$8 sps:$4 sm:$0xff]   ;;  %v1102_v46 = vld [vmem:[#allocation3 + $0x70] ss:$8 sps:$4 sm:$0xff]  }
  0x37   :  { %v1103_v47 = vld [vmem:[#allocation3 + $0xf0] ss:$8 sps:$4 sm:$0xff]   ;;  %v1238_v51 = vld [vmem:[%s1326_s2] ss:$0 sm:$0xff]  ;;  %s1182_s2 = smov [#allocation8]  }
  0x38   :  { %v1243_v57 = vld [vmem:[%s1327_s3] ss:$0 sm:$0xff]  ;;  %s842_s3 = sshll.u32 %s1182_s2, 4  ;;  %s843_s3 = int_to_ptr.vmem [resolvable:$true] %s842_s3 }
  0x39   :  { %914 = vmatpush3.bf16.msra.mxu0 %v1049_v9  ;;  %1029 = vmatpush3.bf16.msra.mxu1 %v1049_v9  ;;  %s1148_s19 = scalar_lea.vmem %s843_s3, 4096  ;;  %p1153_p3 = scmp.lt.s32.totalorder %s843_s3, %s843_s3 }
  0x3a   :  { %915 = vmatprep.subr.bf16.mxu0 %v1050_v10  ;;  %1022 = vmatprep.subr.bf16.mxu1 %v1050_v10  ;;  %p1149_p2 = scmp.ne.s32.totalorder %s843_s3, %s1148_s19  ;;  %p1154_p4 = scmp.lt.s32.totalorder %s1148_s19, %s1148_s19 }
  0x3c   :  { %p1155_p5 = por %p1154_p4, %p1153_p3 }
  0x3d   :  { %916 = vmatpush3.bf16.msra.mxu0 %v1051_v13  ;;  %1030 = vmatpush3.bf16.msra.mxu1 %v1051_v13 }
  0x3e   :  { %917 = vmatprep.subr.bf16.mxu0 %v1052_v14  ;;  %1023 = vmatprep.subr.bf16.mxu1 %v1052_v14  ;;  %p1156_p6 = pnand %p1155_p5, %p1149_p2 }
  0x41   :  { %918 = vmatpush3.bf16.msra.mxu0 %v1053_v15  ;;  %1031 = vmatpush3.bf16.msra.mxu1 %v1053_v15 }
  0x42   :  { %919 = vmatprep.subr.bf16.mxu0 %v1054_v16  ;;  %1024 = vmatprep.subr.bf16.mxu1 %v1054_v16 }
  0x45   :  { %920 = vmatpush3.bf16.msra.mxu0 %v1055_v17  ;;  %1032 = vmatpush3.bf16.msra.mxu1 %v1055_v17 }
  0x48   :  { %468 = vmatmul.mubr.bf16.vlgmr.msra.gmra.mrb[0].mxu0 %v1056_v18  ;;  %532 = vmatmul.mubr.bf16.vlgmr.msra.gmra.mrb[0].mxu1 %v1059_v19 }
  0x49   :  { %475 = vmatprep.mubr.bf16.mxu0 %v1062_v20  ;;  %539 = vmatprep.mubr.bf16.mxu1 %v1064_v21 }
  0x50   :  { %476 = vmatmul.mubr.bf16.gmra.mrb[4].mxu0 %v1066_v22  ;;  %540 = vmatmul.mubr.bf16.gmra.mrb[4].mxu1 %v1067_v23 }
  0x51   :  { %483 = vmatprep.mubr.bf16.mxu0 %v1068_v24  ;;  %547 = vmatprep.mubr.bf16.mxu1 %v1070_v25 }
  0x58   :  { %484 = vmatmul.mubr.bf16.gmra.mrb[8].mxu0 %v1072_v26  ;;  %548 = vmatmul.mubr.bf16.gmra.mrb[8].mxu1 %v1073_v27 }
  0x59   :  { %491 = vmatprep.mubr.bf16.mxu0 %v1074_v28  ;;  %555 = vmatprep.mubr.bf16.mxu1 %v1076_v29 }
  0x60   :  { %492 = vmatmul.mubr.bf16.gmra.mrb[12].mxu0 %v1078_v30  ;;  %556 = vmatmul.mubr.bf16.gmra.mrb[12].mxu1 %v1079_v31 }
  0x61   :  { %499 = vmatprep.mubr.bf16.mxu0 %v1080_v32  ;;  %563 = vmatprep.mubr.bf16.mxu1 %v1082_v33 }
  0x68   :  { %500 = vmatmul.mubr.bf16.gmra.mrb[16].mxu0 %v1084_v34  ;;  %564 = vmatmul.mubr.bf16.gmra.mrb[16].mxu1 %v1085_v35 }
  0x69   :  { %507 = vmatprep.mubr.bf16.mxu0 %v1086_v36  ;;  %571 = vmatprep.mubr.bf16.mxu1 %v1088_v37 }
  0x70   :  { %508 = vmatmul.mubr.bf16.gmra.mrb[20].mxu0 %v1090_v38  ;;  %572 = vmatmul.mubr.bf16.gmra.mrb[20].mxu1 %v1091_v39 }
  0x71   :  { %515 = vmatprep.mubr.bf16.mxu0 %v1092_v40  ;;  %579 = vmatprep.mubr.bf16.mxu1 %v1094_v41 }
  0x78   :  { %516 = vmatmul.mubr.bf16.gmra.mrb[24].mxu0 %v1096_v42  ;;  %580 = vmatmul.mubr.bf16.gmra.mrb[24].mxu1 %v1097_v43 }
  0x79   :  { %523 = vmatprep.mubr.bf16.mxu0 %v1098_v44  ;;  %587 = vmatprep.mubr.bf16.mxu1 %v1100_v45 }
  0x80   :  { %524 = vmatmul.mubr.bf16.gmra.mrb[28].mxu0 %v1102_v46  ;;  %588 = vmatmul.mubr.bf16.gmra.mrb[28].mxu1 %v1103_v47 }
 0x11b   :  { %v921_v48 = vpop.f32.mrb[0].mxu0  ;;  %v969_v49 = vpop.f32.mrb[0].mxu1 }
 0x11c   :  { %v922_v50 = vpop.f32.mrb[1].mxu0  ;;  %v970_v52 = vpop.f32.mrb[1].mxu1 }
 0x11d   :  { %v923_v53 = vadd.f32 %v922_v50, %v921_v48  ;;  %v971_v54 = vadd.f32 %v970_v52, %v969_v49  ;;  %v924_v55 = vpop.f32.mrb[2].mxu0  ;;  %v972_v56 = vpop.f32.mrb[2].mxu1 }
 0x11e   :  { %v925_v58 = vpop.f32.mrb[3].mxu0  ;;  %v973_v59 = vpop.f32.mrb[3].mxu1 }
 0x11f   :  { %v702_v60 = vmul.f32 %v923_v53, %v1238_v51  ;;  %v718_v61 = vmul.f32 %v971_v54, %v1238_v51  ;;  %v926_v62 = vadd.f32 %v925_v58, %v924_v55  ;;  %v974_v63 = vadd.f32 %v973_v59, %v972_v56 }
 0x121   :  { %v741_v0 = vadd.f32 %v1243_v57, %v702_v60  ;;  %v757_v1 = vadd.f32 %v1243_v57, %v718_v61  ;;  %v703_v2 = vmul.f32 %v926_v62, %v1238_v51  ;;  %v719_v3 = vmul.f32 %v974_v63, %v1238_v51 }
 0x123   :  { %v773_v4 = vmax.f32 %v741_v0, 0.0  ;;  %v789_v5 = vmax.f32 %v757_v1, 0.0  ;;  %v742_v6 = vadd.f32 %v1243_v57, %v703_v2  ;;  %v758_v7 = vadd.f32 %v1243_v57, %v719_v3  ;;  %v927_v8 = vpop.f32.mrb[4].mxu0  ;;  %v975_v9 = vpop.f32.mrb[4].mxu1 }
 0x124   :  { %v928_v10 = vpop.f32.mrb[5].mxu0  ;;  %v976_v11 = vpop.f32.mrb[5].mxu1 }
 0x125   :  { %805 = vst [vmem:[#allocation8] sm:$0xff] %v773_v4  ;;  %821 = vst [vmem:[#allocation8 + $0x80] sm:$0xff] %v789_v5  ;;  %v774_v12 = vmax.f32 %v742_v6, 0.0  ;;  %v790_v13 = vmax.f32 %v758_v7, 0.0  ;;  %v929_v14 = vadd.f32 %v928_v10, %v927_v8  ;;  %v977_v15 = vadd.f32 %v976_v11, %v975_v9  ;;  %v930_v16 = vpop.f32.mrb[6].mxu0  ;;  %v978_v17 = vpop.f32.mrb[6].mxu1 }
 0x126   :  { %v931_v18 = vpop.f32.mrb[7].mxu0  ;;  %v979_v19 = vpop.f32.mrb[7].mxu1 }
 0x127   :  { %806 = vst [vmem:[#allocation8 + $0x8] sm:$0xff] %v774_v12  ;;  %822 = vst [vmem:[#allocation8 + $0x88] sm:$0xff] %v790_v13  ;;  %v704_v20 = vmul.f32 %v929_v14, %v1238_v51  ;;  %v720_v21 = vmul.f32 %v977_v15, %v1238_v51  ;;  %v932_v22 = vadd.f32 %v931_v18, %v930_v16 }
 0x128   :  { %v980_v23 = vadd.f32 %v979_v19, %v978_v17 }
 0x129   :  { %v743_v24 = vadd.f32 %v1243_v57, %v704_v20  ;;  %v759_v25 = vadd.f32 %v1243_v57, %v720_v21  ;;  %v705_v26 = vmul.f32 %v932_v22, %v1238_v51 }
 0x12a   :  { %v721_v27 = vmul.f32 %v980_v23, %v1238_v51 }
 0x12b   :  { %v775_v28 = vmax.f32 %v743_v24, 0.0  ;;  %v791_v29 = vmax.f32 %v759_v25, 0.0  ;;  %v744_v30 = vadd.f32 %v1243_v57, %v705_v26  ;;  %v933_v32 = vpop.f32.mrb[8].mxu0  ;;  %v981_v33 = vpop.f32.mrb[8].mxu1 }
 0x12c   :  { %v760_v31 = vadd.f32 %v1243_v57, %v721_v27  ;;  %v934_v34 = vpop.f32.mrb[9].mxu0  ;;  %v982_v35 = vpop.f32.mrb[9].mxu1 }
 0x12d   :  { %807 = vst [vmem:[#allocation8 + $0x10] sm:$0xff] %v775_v28  ;;  %823 = vst [vmem:[#allocation8 + $0x90] sm:$0xff] %v791_v29  ;;  %v776_v36 = vmax.f32 %v744_v30, 0.0  ;;  %v935_v38 = vadd.f32 %v934_v34, %v933_v32  ;;  %v983_v39 = vadd.f32 %v982_v35, %v981_v33  ;;  %v936_v40 = vpop.f32.mrb[10].mxu0  ;;  %v984_v41 = vpop.f32.mrb[10].mxu1 }
 0x12e   :  { %v792_v37 = vmax.f32 %v760_v31, 0.0  ;;  %v937_v42 = vpop.f32.mrb[11].mxu0  ;;  %v985_v43 = vpop.f32.mrb[11].mxu1 }
 0x12f   :  { %808 = vst [vmem:[#allocation8 + $0x18] sm:$0xff] %v776_v36  ;;  %v706_v44 = vmul.f32 %v935_v38, %v1238_v51  ;;  %v722_v45 = vmul.f32 %v983_v39, %v1238_v51  ;;  %v938_v46 = vadd.f32 %v937_v42, %v936_v40  ;;  %v986_v47 = vadd.f32 %v985_v43, %v984_v41 }
 0x130   :  { %824 = vst [vmem:[#allocation8 + $0x98] sm:$0xff] %v792_v37 }
 0x131   :  { %v745_v48 = vadd.f32 %v1243_v57, %v706_v44  ;;  %v761_v49 = vadd.f32 %v1243_v57, %v722_v45  ;;  %v707_v50 = vmul.f32 %v938_v46, %v1238_v51  ;;  %v723_v52 = vmul.f32 %v986_v47, %v1238_v51 }
 0x133   :  { %v777_v53 = vmax.f32 %v745_v48, 0.0  ;;  %v793_v54 = vmax.f32 %v761_v49, 0.0  ;;  %v746_v55 = vadd.f32 %v1243_v57, %v707_v50  ;;  %v762_v56 = vadd.f32 %v1243_v57, %v723_v52  ;;  %v939_v58 = vpop.f32.mrb[12].mxu0  ;;  %v987_v59 = vpop.f32.mrb[12].mxu1 }
 0x134   :  { %v940_v60 = vpop.f32.mrb[13].mxu0  ;;  %v988_v61 = vpop.f32.mrb[13].mxu1 }
 0x135   :  { %809 = vst [vmem:[#allocation8 + $0x20] sm:$0xff] %v777_v53  ;;  %825 = vst [vmem:[#allocation8 + $0xa0] sm:$0xff] %v793_v54  ;;  %v778_v62 = vmax.f32 %v746_v55, 0.0  ;;  %v794_v63 = vmax.f32 %v762_v56, 0.0  ;;  %v941_v0 = vadd.f32 %v940_v60, %v939_v58  ;;  %v989_v1 = vadd.f32 %v988_v61, %v987_v59  ;;  %v942_v2 = vpop.f32.mrb[14].mxu0  ;;  %v990_v3 = vpop.f32.mrb[14].mxu1 }
 0x136   :  { %v943_v4 = vpop.f32.mrb[15].mxu0  ;;  %v991_v5 = vpop.f32.mrb[15].mxu1 }
 0x137   :  { %810 = vst [vmem:[#allocation8 + $0x28] sm:$0xff] %v778_v62  ;;  %826 = vst [vmem:[#allocation8 + $0xa8] sm:$0xff] %v794_v63  ;;  %v708_v6 = vmul.f32 %v941_v0, %v1238_v51  ;;  %v724_v7 = vmul.f32 %v989_v1, %v1238_v51  ;;  %v944_v8 = vadd.f32 %v943_v4, %v942_v2 }
 0x138   :  { %v992_v9 = vadd.f32 %v991_v5, %v990_v3 }
 0x139   :  { %v747_v10 = vadd.f32 %v1243_v57, %v708_v6  ;;  %v763_v11 = vadd.f32 %v1243_v57, %v724_v7  ;;  %v709_v12 = vmul.f32 %v944_v8, %v1238_v51 }
 0x13a   :  { %v725_v13 = vmul.f32 %v992_v9, %v1238_v51 }
 0x13b   :  { %v779_v14 = vmax.f32 %v747_v10, 0.0  ;;  %v795_v15 = vmax.f32 %v763_v11, 0.0  ;;  %v748_v16 = vadd.f32 %v1243_v57, %v709_v12  ;;  %v945_v18 = vpop.f32.mrb[16].mxu0  ;;  %v993_v19 = vpop.f32.mrb[16].mxu1 }
 0x13c   :  { %v764_v17 = vadd.f32 %v1243_v57, %v725_v13  ;;  %v946_v20 = vpop.f32.mrb[17].mxu0  ;;  %v994_v21 = vpop.f32.mrb[17].mxu1 }
 0x13d   :  { %811 = vst [vmem:[#allocation8 + $0x30] sm:$0xff] %v779_v14  ;;  %827 = vst [vmem:[#allocation8 + $0xb0] sm:$0xff] %v795_v15  ;;  %v780_v22 = vmax.f32 %v748_v16, 0.0  ;;  %v947_v24 = vadd.f32 %v946_v20, %v945_v18  ;;  %v995_v25 = vadd.f32 %v994_v21, %v993_v19  ;;  %v948_v26 = vpop.f32.mrb[18].mxu0  ;;  %v996_v27 = vpop.f32.mrb[18].mxu1 }
 0x13e   :  { %v796_v23 = vmax.f32 %v764_v17, 0.0  ;;  %v949_v28 = vpop.f32.mrb[19].mxu0  ;;  %v997_v29 = vpop.f32.mrb[19].mxu1 }
 0x13f   :  { %812 = vst [vmem:[#allocation8 + $0x38] sm:$0xff] %v780_v22  ;;  %v710_v30 = vmul.f32 %v947_v24, %v1238_v51  ;;  %v726_v31 = vmul.f32 %v995_v25, %v1238_v51  ;;  %v950_v32 = vadd.f32 %v949_v28, %v948_v26  ;;  %v998_v33 = vadd.f32 %v997_v29, %v996_v27 }
 0x140   :  { %828 = vst [vmem:[#allocation8 + $0xb8] sm:$0xff] %v796_v23 }
 0x141   :  { %v749_v34 = vadd.f32 %v1243_v57, %v710_v30  ;;  %v765_v35 = vadd.f32 %v1243_v57, %v726_v31  ;;  %v711_v36 = vmul.f32 %v950_v32, %v1238_v51  ;;  %v727_v37 = vmul.f32 %v998_v33, %v1238_v51 }
 0x143   :  { %v781_v38 = vmax.f32 %v749_v34, 0.0  ;;  %v797_v39 = vmax.f32 %v765_v35, 0.0  ;;  %v750_v40 = vadd.f32 %v1243_v57, %v711_v36  ;;  %v766_v41 = vadd.f32 %v1243_v57, %v727_v37  ;;  %v951_v42 = vpop.f32.mrb[20].mxu0  ;;  %v999_v43 = vpop.f32.mrb[20].mxu1 }
 0x144   :  { %v952_v44 = vpop.f32.mrb[21].mxu0  ;;  %v1000_v45 = vpop.f32.mrb[21].mxu1 }
 0x145   :  { %813 = vst [vmem:[#allocation8 + $0x40] sm:$0xff] %v781_v38  ;;  %829 = vst [vmem:[#allocation8 + $0xc0] sm:$0xff] %v797_v39  ;;  %v782_v46 = vmax.f32 %v750_v40, 0.0  ;;  %v798_v47 = vmax.f32 %v766_v41, 0.0  ;;  %v953_v48 = vadd.f32 %v952_v44, %v951_v42  ;;  %v1001_v49 = vadd.f32 %v1000_v45, %v999_v43  ;;  %v954_v50 = vpop.f32.mrb[22].mxu0  ;;  %v1002_v52 = vpop.f32.mrb[22].mxu1 }
 0x146   :  { %v955_v53 = vpop.f32.mrb[23].mxu0  ;;  %v1003_v54 = vpop.f32.mrb[23].mxu1 }
 0x147   :  { %814 = vst [vmem:[#allocation8 + $0x48] sm:$0xff] %v782_v46  ;;  %830 = vst [vmem:[#allocation8 + $0xc8] sm:$0xff] %v798_v47  ;;  %v712_v55 = vmul.f32 %v953_v48, %v1238_v51  ;;  %v728_v56 = vmul.f32 %v1001_v49, %v1238_v51  ;;  %v956_v58 = vadd.f32 %v955_v53, %v954_v50 }
 0x148   :  { %v1004_v59 = vadd.f32 %v1003_v54, %v1002_v52 }
 0x149   :  { %v751_v60 = vadd.f32 %v1243_v57, %v712_v55  ;;  %v767_v61 = vadd.f32 %v1243_v57, %v728_v56  ;;  %v713_v62 = vmul.f32 %v956_v58, %v1238_v51 }
 0x14a   :  { %v729_v63 = vmul.f32 %v1004_v59, %v1238_v51 }
 0x14b   :  { %v783_v0 = vmax.f32 %v751_v60, 0.0  ;;  %v799_v1 = vmax.f32 %v767_v61, 0.0  ;;  %v752_v2 = vadd.f32 %v1243_v57, %v713_v62  ;;  %v957_v4 = vpop.f32.mrb[24].mxu0  ;;  %v1005_v5 = vpop.f32.mrb[24].mxu1 }
 0x14c   :  { %v768_v3 = vadd.f32 %v1243_v57, %v729_v63  ;;  %v958_v6 = vpop.f32.mrb[25].mxu0  ;;  %v1006_v7 = vpop.f32.mrb[25].mxu1 }
 0x14d   :  { %815 = vst [vmem:[#allocation8 + $0x50] sm:$0xff] %v783_v0  ;;  %831 = vst [vmem:[#allocation8 + $0xd0] sm:$0xff] %v799_v1  ;;  %v784_v8 = vmax.f32 %v752_v2, 0.0  ;;  %v959_v10 = vadd.f32 %v958_v6, %v957_v4  ;;  %v1007_v11 = vadd.f32 %v1006_v7, %v1005_v5  ;;  %v960_v12 = vpop.f32.mrb[26].mxu0  ;;  %v1008_v13 = vpop.f32.mrb[26].mxu1 }
 0x14e   :  { %v800_v9 = vmax.f32 %v768_v3, 0.0  ;;  %v961_v14 = vpop.f32.mrb[27].mxu0  ;;  %v1009_v15 = vpop.f32.mrb[27].mxu1 }
 0x14f   :  { %816 = vst [vmem:[#allocation8 + $0x58] sm:$0xff] %v784_v8  ;;  %v714_v16 = vmul.f32 %v959_v10, %v1238_v51  ;;  %v730_v17 = vmul.f32 %v1007_v11, %v1238_v51  ;;  %v962_v18 = vadd.f32 %v961_v14, %v960_v12  ;;  %v1010_v19 = vadd.f32 %v1009_v15, %v1008_v13 }
 0x150   :  { %832 = vst [vmem:[#allocation8 + $0xd8] sm:$0xff] %v800_v9 }
 0x151   :  { %v753_v20 = vadd.f32 %v1243_v57, %v714_v16  ;;  %v769_v21 = vadd.f32 %v1243_v57, %v730_v17  ;;  %v715_v22 = vmul.f32 %v962_v18, %v1238_v51  ;;  %v731_v23 = vmul.f32 %v1010_v19, %v1238_v51 }
 0x153   :  { %v785_v24 = vmax.f32 %v753_v20, 0.0  ;;  %v801_v25 = vmax.f32 %v769_v21, 0.0  ;;  %v754_v26 = vadd.f32 %v1243_v57, %v715_v22  ;;  %v770_v27 = vadd.f32 %v1243_v57, %v731_v23  ;;  %v963_v28 = vpop.f32.mrb[28].mxu0  ;;  %v1011_v29 = vpop.f32.mrb[28].mxu1 }
 0x154   :  { %v964_v30 = vpop.f32.mrb[29].mxu0  ;;  %v1012_v31 = vpop.f32.mrb[29].mxu1 }
 0x155   :  { %817 = vst [vmem:[#allocation8 + $0x60] sm:$0xff] %v785_v24  ;;  %833 = vst [vmem:[#allocation8 + $0xe0] sm:$0xff] %v801_v25  ;;  %v786_v32 = vmax.f32 %v754_v26, 0.0  ;;  %v802_v33 = vmax.f32 %v770_v27, 0.0  ;;  %v965_v34 = vadd.f32 %v964_v30, %v963_v28  ;;  %v1013_v35 = vadd.f32 %v1012_v31, %v1011_v29  ;;  %v966_v36 = vpop.f32.mrb[30].mxu0  ;;  %v1014_v37 = vpop.f32.mrb[30].mxu1 }
 0x156   :  { %v967_v38 = vpop.f32.mrb[31].mxu0  ;;  %v1015_v39 = vpop.f32.mrb[31].mxu1 }
 0x157   :  { %818 = vst [vmem:[#allocation8 + $0x68] sm:$0xff] %v786_v32  ;;  %834 = vst [vmem:[#allocation8 + $0xe8] sm:$0xff] %v802_v33  ;;  %v716_v40 = vmul.f32 %v965_v34, %v1238_v51  ;;  %v732_v41 = vmul.f32 %v1013_v35, %v1238_v51  ;;  %v968_v42 = vadd.f32 %v967_v38, %v966_v36 }
 0x158   :  { %v1016_v43 = vadd.f32 %v1015_v39, %v1014_v37 }
 0x159   :  { %v755_v44 = vadd.f32 %v1243_v57, %v716_v40  ;;  %v771_v45 = vadd.f32 %v1243_v57, %v732_v41  ;;  %v717_v46 = vmul.f32 %v968_v42, %v1238_v51 }
 0x15a   :  { %v733_v47 = vmul.f32 %v1016_v43, %v1238_v51 }
 0x15b   :  { %v787_v48 = vmax.f32 %v755_v44, 0.0  ;;  %v803_v49 = vmax.f32 %v771_v45, 0.0  ;;  %v756_v50 = vadd.f32 %v1243_v57, %v717_v46 }
 0x15c   :  { %v772_v52 = vadd.f32 %v1243_v57, %v733_v47 }
 0x15d   :  { %819 = vst [vmem:[#allocation8 + $0x70] sm:$0xff] %v787_v48  ;;  %835 = vst [vmem:[#allocation8 + $0xf0] sm:$0xff] %v803_v49  ;;  %v788_v53 = vmax.f32 %v756_v50, 0.0 }
 0x15e   :  { %v804_v54 = vmax.f32 %v772_v52, 0.0 }
 0x15f   :  { %820 = vst [vmem:[#allocation8 + $0x78] sm:$0xff] %v788_v53 }
 0x160   :  { %836 = vst [vmem:[#allocation8 + $0xf8] sm:$0xff] %v804_v54 }
 0x161   :  { %1159 = shalt.err (!%p1156_p6)
}
 0x162   :  { %s1160_s22 = scalar_lea.hbm %s1328_s4, 4096 }
 0x163   :  { %p1161_p7 = scmp.ne.s32.totalorder %s1328_s4, %s1160_s22  ;;  %p1164_p8 = scmp.lt.u32.totalorder %s1160_s22, %s1328_s4 }
 0x165   :  { %p1166_p9 = pnand %p1164_p8, %p1161_p7 }
 0x167   :  { %1169 = shalt.err (!%p1166_p9)
}
 0x168   :  { %848 = dma.vmem_to_hbm [thread:$0]  %s843_s3, 4096, %s1328_s4, [#allocation5], %s1177_s25, %s1177_s25, %s1178_s26  }
 0x169   :  { %1174 = dma.done.wait [#allocation5], 4096  }
 0x16a   :  { %1175 = vsyncadd [#allocation5], 4294963200 }
 0x16b   :  { %852 = vsyncpa [#allocation4], 1 }
 0x16c   :  { %853 = vsyncpa [#allocation7], 1 }
 0x16d   :  { %854 = vsyncpa [#allocation5], 1 }

</bundles_post_ra>
